<compile_context>
chip_gen: v7x
topology: tpu7x:2x2x1
jax: 0.10.0
libtpu: 0.0.40
codegen_flags: <defaults>
</compile_context>

<pallas_src>
import functools
import math

import jax
import jax.numpy as jnp
from jax import lax
from jax.experimental import pallas as pl
from jax.experimental.pallas import tpu as pltpu


def _i32(v):
    """Python int -> two's-complement int32 value."""
    v &= 0xFFFFFFFF
    return v - (1 << 32) if v >= (1 << 31) else v


_WEYL = _i32(0x9E3779B9)    # golden-ratio increment
_M1 = _i32(0x7FEB352D)      # lowbias32 finalizer constants
_M2 = _i32(0x846CA68B)
_SALT1 = _i32(0x3C6EF372)
_SALT2 = _i32(0x85EBCA77)


def _srl(x, n):
    return lax.shift_right_logical(x, jnp.int32(n))


def _uniform01(idx, seed, salt):
    """Counter-based hash (lowbias32 finalizer) -> f32 uniform in (0, 1]."""
    x = idx * jnp.int32(_WEYL) + seed + jnp.int32(salt)
    x = (x ^ _srl(x, 16)) * jnp.int32(_M1)
    x = (x ^ _srl(x, 15)) * jnp.int32(_M2)
    x = x ^ _srl(x, 16)
    bits24 = _srl(x, 8)                           # 24 random bits, non-negative
    # +1 maps to (0, 1]: log(u) stays finite and no extra `1-u` pass is needed.
    return (bits24 + 1).astype(jnp.float32) * jnp.float32(1.0 / (1 << 24))


def gaussian_noise_kernel(seed_ref, x_ref, o_ref, *, std, use_pair):
    tr, w = x_ref.shape                           # static block shape
    seed = seed_ref[0]                            # SMEM scalar (prefetched)
    base_row = pl.program_id(0) * tr              # global row offset of tile

    neg2var = jnp.float32(-2.0 * std * std)       # fold var into the BM radius
    two_pi = jnp.float32(2.0 * math.pi)

    half = tr // 2 if use_pair else tr

    # Global flat element index of every (first-half) element -> PRNG counter.
    # Row offsets are a cheap (half, 1) column, broadcast against the lane iota.
    row_off = (lax.broadcasted_iota(jnp.int32, (half, 1), 0)
               + jnp.int32(base_row)) * jnp.int32(w)
    idx = row_off + lax.broadcasted_iota(jnp.int32, (half, w), 1)

    u1 = _uniform01(idx, seed, _SALT1)
    u2 = _uniform01(idx, seed, _SALT2)
    r = jnp.sqrt(neg2var * jnp.log(u1))           # r = std * sqrt(-2 ln u1)
    c = jnp.cos(two_pi * u2)

    if use_pair:
        # Both Box-Muller outputs; sin recovered from cos (sign from u2), so
        # only one trig transcendental per pair of output elements.
        s = jnp.where(u2 <= 0.5, jnp.float32(1.0), jnp.float32(-1.0)) \
            * jnp.sqrt(jnp.maximum(1.0 - c * c, 0.0))
        top = pl.ds(0, half)
        bot = pl.ds(half, half)
        o_ref[top, :] = (x_ref[top, :].astype(jnp.float32) + r * c).astype(o_ref.dtype)
        o_ref[bot, :] = (x_ref[bot, :].astype(jnp.float32) + r * s).astype(o_ref.dtype)
    else:
        o_ref[...] = (x_ref[...].astype(jnp.float32) + r * c).astype(o_ref.dtype)


def _pick_tiling(rows, w, itemsize):
    """Pick a row-tile under a VMEM byte budget with enough grid steps."""
    pack = max(8, 32 // itemsize)                 # sublane packing: f32 8, bf16 16, i8 32
    align = 2 * pack                              # so each half-tile is tile aligned

    # Per block: 2x(in) + 2x(out) data buffers plus ~8 f32 full-block temporaries.
    budget = 8 * 1024 * 1024
    bytes_per_row = w * (4 * itemsize + 8 * 4)
    tr = max(align, (budget // bytes_per_row) // align * align)

    if rows >= 8 * align:
        # Big input: aim for >= ~8 grid steps (pipelining + megacore sharding).
        tr = min(tr, max(align, (rows // 8) // align * align))
    elif rows >= 2 * align:
        # Medium input: at least 2 blocks so both v7x TensorCores get work.
        tr = min(tr, max(align, (rows // 2) // align * align))
    else:
        tr = min(tr, rows)                        # single small block (full dim)

    use_pair = (tr % 2 == 0) and ((tr // 2) % pack == 0)
    return tr, use_pair


def gaussian_noise(x, seed, var=0.1):
    """JAX equivalent of GaussianNoise(var).forward(x)."""
    orig_shape = x.shape
    dtype = x.dtype
    itemsize = jnp.dtype(dtype).itemsize
    n = int(x.size)
    if n == 0:
        return x
    std = float(var) ** 0.5

    # Lane-dense slab: flatten and re-tile as (rows, W) with W % 128 == 0 so
    # every output store is an unmasked, lane-dense vst.
    w = 512 if n >= 512 else 128
    n_pad = pl.cdiv(n, w) * w
    x_flat = x.reshape(-1)
    if n_pad != n:
        x_flat = jnp.pad(x_flat, (0, n_pad - n))
    rows = n_pad // w
    x2 = x_flat.reshape(rows, w)

    tr, use_pair = _pick_tiling(rows, w, itemsize)
    grid = (pl.cdiv(rows, tr),)

    seed_arr = jnp.asarray([seed], dtype=jnp.int32)

    cost = pl.CostEstimate(
        flops=25 * n,
        transcendentals=(2 * n) if use_pair else (3 * n),
        bytes_accessed=2 * n * itemsize,
    )

    out = pl.pallas_call(
        functools.partial(gaussian_noise_kernel, std=std, use_pair=use_pair),
        out_shape=jax.ShapeDtypeStruct((rows, w), dtype),
        grid_spec=pltpu.PrefetchScalarGridSpec(
            num_scalar_prefetch=1,
            grid=grid,
            in_specs=[pl.BlockSpec((tr, w), lambda i, seed: (i, 0))],
            out_specs=pl.BlockSpec((tr, w), lambda i, seed: (i, 0)),
        ),
        compiler_params=pltpu.CompilerParams(
            dimension_semantics=("parallel",),
            vmem_limit_bytes=32 * 1024 * 1024,
        ),
        cost_estimate=cost,
    )(seed_arr, x2)

    out_flat = out.reshape(-1)
    if n_pad != n:
        out_flat = out_flat[:n]
    return out_flat.reshape(orig_shape)


if __name__ == "__main__":
    key = jax.random.PRNGKey(0)

    # Sequence data, as the module implies: (batch=2, seq=8, hidden=128).
    x = jax.random.normal(key, (2, 8, 128), dtype=jnp.float32)
    y = jax.block_until_ready(gaussian_noise(x, seed=1234, var=0.1))

    # Sanity checks: shape/dtype preserved, noise has roughly the right scale.
    assert y.shape == x.shape and y.dtype == x.dtype
    noise = y - x
    noise_std = float(jnp.std(noise))
    noise_mean = float(jnp.mean(noise))
    assert 0.2 < noise_std < 0.45, f"unexpected noise std {noise_std}"
    assert abs(noise_mean) < 0.05, f"unexpected noise mean {noise_mean}"

    # Second shape exercises the paired-Box-Muller + multi-block grid path.
    x2 = jax.random.normal(jax.random.PRNGKey(1), (64, 512), dtype=jnp.float32)
    y2 = jax.block_until_ready(gaussian_noise(x2, seed=7, var=0.1))
    assert y2.shape == x2.shape and y2.dtype == x2.dtype
    n2 = y2 - x2
    n2_std = float(jnp.std(n2))
    n2_mean = float(jnp.mean(n2))
    assert 0.25 < n2_std < 0.40, f"unexpected noise std {n2_std}"
    assert abs(n2_mean) < 0.03, f"unexpected noise mean {n2_mean}"

    print("KERNEL_OK")
</pallas_src>

<mosaic_0001>
module attributes {stable_mosaic.version = 11 : i64} {
  func.func @gaussian_noise_kernel(%arg0: i32, %arg1: memref<1xi32, #tpu.memory_space<smem>>, %arg2: memref<4x512xf32, #tpu.memory_space<vmem>>, %arg3: memref<4x512xf32, #tpu.memory_space<vmem>>) attributes {dimension_semantics = [#tpu.dimension_semantics<parallel>], iteration_bounds = array<i64: 1>, scalar_prefetch = 1 : i64, scratch_operands = 0 : i64, tpu.core_type = #tpu.core_type<tc>, window_params = [{transform_indices = @transform_0, window_bounds = array<i64: 4, 512>}, {transform_indices = @transform_1, window_bounds = array<i64: 4, 512>}]} {
    %c0 = arith.constant 0 : index
    %0 = memref.load %arg1[%c0] : memref<1xi32, #tpu.memory_space<smem>>
    %c4_i32 = arith.constant 4 : i32
    %1 = arith.muli %arg0, %c4_i32 : i32
    %2 = tpu.iota {dimensions = array<i32: 0>} : vector<4x1xi32>
    %3 = vector.broadcast %1 : i32 to vector<4x1xi32>
    %4 = arith.addi %2, %3 : vector<4x1xi32>
    %c512_i32 = arith.constant 512 : i32
    %5 = vector.broadcast %c512_i32 : i32 to vector<4x1xi32>
    %6 = arith.muli %4, %5 : vector<4x1xi32>
    %7 = tpu.iota {dimensions = array<i32: 1>} : vector<4x512xi32>
    %8 = vector.broadcast %6 : vector<4x1xi32> to vector<4x512xi32>
    %9 = arith.addi %8, %7 : vector<4x512xi32>
    %c-1640531527_i32 = arith.constant -1640531527 : i32
    %10 = vector.broadcast %c-1640531527_i32 : i32 to vector<4x512xi32>
    %11 = arith.muli %9, %10 : vector<4x512xi32>
    %12 = vector.broadcast %0 : i32 to vector<4x512xi32>
    %13 = arith.addi %11, %12 : vector<4x512xi32>
    %c1013904242_i32 = arith.constant 1013904242 : i32
    %14 = vector.broadcast %c1013904242_i32 : i32 to vector<4x512xi32>
    %15 = arith.addi %13, %14 : vector<4x512xi32>
    %c16_i32 = arith.constant 16 : i32
    %16 = vector.broadcast %c16_i32 : i32 to vector<4x512xi32>
    %17 = arith.shrui %15, %16 : vector<4x512xi32>
    %18 = arith.xori %15, %17 : vector<4x512xi32>
    %c2146121005_i32 = arith.constant 2146121005 : i32
    %19 = vector.broadcast %c2146121005_i32 : i32 to vector<4x512xi32>
    %20 = arith.muli %18, %19 : vector<4x512xi32>
    %c15_i32 = arith.constant 15 : i32
    %21 = vector.broadcast %c15_i32 : i32 to vector<4x512xi32>
    %22 = arith.shrui %20, %21 : vector<4x512xi32>
    %23 = arith.xori %20, %22 : vector<4x512xi32>
    %c-2073254261_i32 = arith.constant -2073254261 : i32
    %24 = vector.broadcast %c-2073254261_i32 : i32 to vector<4x512xi32>
    %25 = arith.muli %23, %24 : vector<4x512xi32>
    %c16_i32_0 = arith.constant 16 : i32
    %26 = vector.broadcast %c16_i32_0 : i32 to vector<4x512xi32>
    %27 = arith.shrui %25, %26 : vector<4x512xi32>
    %28 = arith.xori %25, %27 : vector<4x512xi32>
    %c8_i32 = arith.constant 8 : i32
    %29 = vector.broadcast %c8_i32 : i32 to vector<4x512xi32>
    %30 = arith.shrui %28, %29 : vector<4x512xi32>
    %c1_i32 = arith.constant 1 : i32
    %31 = vector.broadcast %c1_i32 : i32 to vector<4x512xi32>
    %32 = arith.addi %30, %31 : vector<4x512xi32>
    %33 = arith.sitofp %32 : vector<4x512xi32> to vector<4x512xf32>
    %cst = arith.constant 5.96046448E-8 : f32
    %34 = vector.broadcast %cst : f32 to vector<4x512xf32>
    %35 = arith.mulf %33, %34 : vector<4x512xf32>
    %c-1640531527_i32_1 = arith.constant -1640531527 : i32
    %36 = vector.broadcast %c-1640531527_i32_1 : i32 to vector<4x512xi32>
    %37 = arith.muli %9, %36 : vector<4x512xi32>
    %38 = vector.broadcast %0 : i32 to vector<4x512xi32>
    %39 = arith.addi %37, %38 : vector<4x512xi32>
    %c-2048144777_i32 = arith.constant -2048144777 : i32
    %40 = vector.broadcast %c-2048144777_i32 : i32 to vector<4x512xi32>
    %41 = arith.addi %39, %40 : vector<4x512xi32>
    %c16_i32_2 = arith.constant 16 : i32
    %42 = vector.broadcast %c16_i32_2 : i32 to vector<4x512xi32>
    %43 = arith.shrui %41, %42 : vector<4x512xi32>
    %44 = arith.xori %41, %43 : vector<4x512xi32>
    %c2146121005_i32_3 = arith.constant 2146121005 : i32
    %45 = vector.broadcast %c2146121005_i32_3 : i32 to vector<4x512xi32>
    %46 = arith.muli %44, %45 : vector<4x512xi32>
    %c15_i32_4 = arith.constant 15 : i32
    %47 = vector.broadcast %c15_i32_4 : i32 to vector<4x512xi32>
    %48 = arith.shrui %46, %47 : vector<4x512xi32>
    %49 = arith.xori %46, %48 : vector<4x512xi32>
    %c-2073254261_i32_5 = arith.constant -2073254261 : i32
    %50 = vector.broadcast %c-2073254261_i32_5 : i32 to vector<4x512xi32>
    %51 = arith.muli %49, %50 : vector<4x512xi32>
    %c16_i32_6 = arith.constant 16 : i32
    %52 = vector.broadcast %c16_i32_6 : i32 to vector<4x512xi32>
    %53 = arith.shrui %51, %52 : vector<4x512xi32>
    %54 = arith.xori %51, %53 : vector<4x512xi32>
    %c8_i32_7 = arith.constant 8 : i32
    %55 = vector.broadcast %c8_i32_7 : i32 to vector<4x512xi32>
    %56 = arith.shrui %54, %55 : vector<4x512xi32>
    %c1_i32_8 = arith.constant 1 : i32
    %57 = vector.broadcast %c1_i32_8 : i32 to vector<4x512xi32>
    %58 = arith.addi %56, %57 : vector<4x512xi32>
    %59 = arith.sitofp %58 : vector<4x512xi32> to vector<4x512xf32>
    %cst_9 = arith.constant 5.96046448E-8 : f32
    %60 = vector.broadcast %cst_9 : f32 to vector<4x512xf32>
    %61 = arith.mulf %59, %60 : vector<4x512xf32>
    %62 = math.log %35 : vector<4x512xf32>
    %cst_10 = arith.constant -2.000000e-01 : f32
    %63 = vector.broadcast %cst_10 : f32 to vector<4x512xf32>
    %64 = arith.mulf %63, %62 : vector<4x512xf32>
    %65 = math.sqrt %64 : vector<4x512xf32>
    %cst_11 = arith.constant 6.28318548 : f32
    %66 = vector.broadcast %cst_11 : f32 to vector<4x512xf32>
    %67 = arith.mulf %66, %61 : vector<4x512xf32>
    %68 = math.cos %67 : vector<4x512xf32>
    %c0_12 = arith.constant 0 : index
    %c0_13 = arith.constant 0 : index
    %69 = vector.load %arg2[%c0_12, %c0_13] : memref<4x512xf32, #tpu.memory_space<vmem>>, vector<4x512xf32>
    %70 = arith.mulf %65, %68 : vector<4x512xf32>
    %71 = arith.addf %69, %70 : vector<4x512xf32>
    %c0_14 = arith.constant 0 : index
    %c0_15 = arith.constant 0 : index
    %72 = vector.load %arg3[%c0_14, %c0_15] : memref<4x512xf32, #tpu.memory_space<vmem>>, vector<4x512xf32>
    tpu.vector_store %arg3[%c0_14, %c0_15], %71 {strides = array<i32>} : memref<4x512xf32, #tpu.memory_space<vmem>>, vector<4x512xf32>,
    return
  }
  func.func @transform_0(%arg0: i32, %arg1: memref<1xi32, #tpu.memory_space<smem>>) -> (i32, i32) {
    %c0_i32 = arith.constant 0 : i32
    %c0_i32_0 = arith.constant 0 : i32
    return %arg0, %c0_i32 : i32, i32
  }
  func.func @transform_1(%arg0: i32, %arg1: memref<1xi32, #tpu.memory_space<smem>>) -> (i32, i32) {
    %c0_i32 = arith.constant 0 : i32
    %c0_i32_0 = arith.constant 0 : i32
    return %arg0, %c0_i32 : i32, i32
  }
}

</mosaic_0001>

<bundles_post_ra>
// kernel: tpu_custom_call.1
= control target key start
LH: loop header
LB: loop body
LE: loop exit
PB: predicated region body
PF: predicated region fallthrough
CT: control target
= control target key end

     0   :  { %8 = vsyncpa [#allocation5], 0  ;;  %s1143_s0 = inlined_call_operand.<no memory space> [shape: s32[1], index: 0, kind: input, shape index: {}]   ;;  %s1144_s1 = inlined_call_operand.hbm [shape: f32[4,512], index: 1, kind: input, shape index: {}]   ;;  %s1145_s2 = inlined_call_operand.hbm [shape: f32[4,512], index: 2, kind: output, shape index: {}]  }
   0x1   :  { %9 = vsyncpa [#allocation6], 0  ;;  %s761_s9 = smov [#allocation4]   ;;  %s713_s13 = scalar_lea.hbm %s1144_s1, 256 }
   0x2   :  { %s16_s10 = sshll.u32 %s761_s9, 4  ;;  %p714_p0 = scmp.ne.s32.totalorder %s1144_s1, %s713_s13  ;;  %s17_s10 = int_to_ptr.vmem [resolvable:$true] %s16_s10 }
   0x3   :  { %p717_p1 = scmp.lt.u32.totalorder %s713_s13, %s1144_s1 }
   0x5   :  { %p719_p2 = pnand %p717_p1, %p714_p0 }
   0x7   :  { %722 = shalt.err (!%p719_p2)
}
   0x8   :  { %s723_s18 = scalar_lea.vmem %s17_s10, 256  ;;  %p728_p4 = scmp.lt.s32.totalorder %s17_s10, %s17_s10 }
   0x9   :  { %p724_p3 = scmp.ne.s32.totalorder %s17_s10, %s723_s18  ;;  %p729_p5 = scmp.lt.s32.totalorder %s723_s18, %s723_s18 }
   0xb   :  { %p730_p6 = por %p729_p5, %p728_p4 }
   0xd   :  { %p731_p7 = pnand %p730_p6, %p724_p3 }
   0xf   :  { %734 = shalt.err (!%p731_p7)
}
  0x10   :  { %19 = dma.hbm_to_vmem [thread:$0]  %s1144_s1, 256, %s17_s10, [#allocation5]  }
  0x11   :  { %757 = dma.done.wait [#allocation5], 256  }
  0x12   :  { %758 = vsyncadd [#allocation5], 4294967040  ;;  %v25_v0 = vlaneseq  ;;  %v43_v11 = vstv %s1143_s0  ;;  %s768_s0 = smov [#allocation7]  }
  0x13   :  { %s632_s1 = sshll.u32 %s768_s0, 4  ;;  %s633_s1 = int_to_ptr.vmem [resolvable:$true] %s632_s1 }
  0x14   :  { %v26_v1 = vshrl.u32 %v25_v0, 7  ;;  %v31_v2 = vand.u32 127, %v25_v0  ;;  %s735_s23 = scalar_lea.vmem %s633_s1, 256  ;;  %p740_p9 = scmp.lt.s32.totalorder %s633_s1, %s633_s1 }
  0x15   :  { %p736_p8 = scmp.ne.s32.totalorder %s633_s1, %s735_s23  ;;  %p741_p10 = scmp.lt.s32.totalorder %s735_s23, %s735_s23 }
  0x16   :  { %v29_v3 = vmul.u32 512, %v26_v1  ;;  %v32_v4 = vadd.s32 128, %v31_v2  ;;  %v33_v5 = vadd.s32 256, %v31_v2  ;;  %v34_v6 = vadd.s32 384, %v31_v2 }
  0x17   :  { %p742_p11 = por %p741_p10, %p740_p9 }
  0x18   :  { %v35_v7 = vadd.s32 %v31_v2, %v29_v3  ;;  %v36_v8 = vadd.s32 %v32_v4, %v29_v3  ;;  %v37_v9 = vadd.s32 %v33_v5, %v29_v3  ;;  %v38_v10 = vadd.s32 %v34_v6, %v29_v3 }
  0x19   :  { %p743_p12 = pnand %p742_p11, %p736_p8 }
  0x1a   :  { %v39_v12 = vmul.u32 2654435769, %v35_v7  ;;  %v40_v13 = vmul.u32 2654435769, %v36_v8 }
  0x1b   :  { %v41_v14 = vmul.u32 2654435769, %v37_v9  ;;  %v42_v15 = vmul.u32 2654435769, %v38_v10 }
  0x1c   :  { %v44_v16 = vadd.s32 %v43_v11, %v39_v12  ;;  %v45_v17 = vadd.s32 %v43_v11, %v40_v13 }
  0x1d   :  { %v46_v18 = vadd.s32 %v43_v11, %v41_v14  ;;  %v47_v19 = vadd.s32 %v43_v11, %v42_v15 }
  0x1e   :  { %v48_v20 = vadd.s32 1013904242, %v44_v16  ;;  %v49_v21 = vadd.s32 1013904242, %v45_v17  ;;  %v100_v22 = vadd.s32 2246822519, %v44_v16 }
  0x1f   :  { %v101_v23 = vadd.s32 2246822519, %v45_v17  ;;  %v102_v25 = vadd.s32 2246822519, %v46_v18  ;;  %v103_v30 = vadd.s32 2246822519, %v47_v19 }
  0x20   :  { %v52_v24 = vshrl.u32 %v48_v20, 16  ;;  %v53_v26 = vshrl.u32 %v49_v21, 16  ;;  %v104_v27 = vshrl.u32 %v100_v22, 16  ;;  %v50_v36 = vadd.s32 1013904242, %v46_v18 }
  0x21   :  { %v105_v28 = vshrl.u32 %v101_v23, 16  ;;  %v106_v31 = vshrl.u32 %v102_v25, 16  ;;  %v107_v39 = vshrl.u32 %v103_v30, 16  ;;  %v51_v43 = vadd.s32 1013904242, %v47_v19 }
  0x22   :  { %v56_v29 = vxor.u32 %v52_v24, %v48_v20  ;;  %v108_v32 = vxor.u32 %v104_v27, %v100_v22  ;;  %v57_v37 = vxor.u32 %v53_v26, %v49_v21  ;;  %v54_v46 = vshrl.u32 %v50_v36, 16 }
  0x23   :  { %v109_v33 = vxor.u32 %v105_v28, %v101_v23  ;;  %v110_v35 = vxor.u32 %v106_v31, %v102_v25  ;;  %v111_v50 = vxor.u32 %v107_v39, %v103_v30  ;;  %v55_v54 = vshrl.u32 %v51_v43, 16 }
  0x24   :  { %v60_v34 = vmul.u32 2146121005, %v56_v29  ;;  %v112_v40 = vmul.u32 2146121005, %v108_v32  ;;  %v58_v57 = vxor.u32 %v54_v46, %v50_v36 }
  0x25   :  { %v113_v41 = vmul.u32 2146121005, %v109_v33  ;;  %v114_v42 = vmul.u32 2146121005, %v110_v35  ;;  %v59_v1 = vxor.u32 %v55_v54, %v51_v43 }
  0x26   :  { %v64_v38 = vshrl.u32 %v60_v34, 15  ;;  %v116_v44 = vshrl.u32 %v112_v40, 15  ;;  %v61_v47 = vmul.u32 2146121005, %v57_v37  ;;  %v115_v61 = vmul.u32 2146121005, %v111_v50 }
  0x27   :  { %v117_v45 = vshrl.u32 %v113_v41, 15  ;;  %v118_v48 = vshrl.u32 %v114_v42, 15  ;;  %v62_v4 = vmul.u32 2146121005, %v58_v57  ;;  %v63_v11 = vmul.u32 2146121005, %v59_v1 }
  0x28   :  { %v68_v49 = vxor.u32 %v64_v38, %v60_v34  ;;  %v120_v51 = vxor.u32 %v116_v44, %v112_v40  ;;  %v65_v58 = vshrl.u32 %v61_v47, 15  ;;  %v119_v8 = vshrl.u32 %v115_v61, 15 }
  0x29   :  { %v121_v52 = vxor.u32 %v117_v45, %v113_v41  ;;  %v122_v53 = vxor.u32 %v118_v48, %v114_v42  ;;  %v66_v14 = vshrl.u32 %v62_v4, 15  ;;  %v67_v21 = vshrl.u32 %v63_v11, 15 }
  0x2a   :  { %v124_v55 = vmul.u32 2221713035, %v120_v51  ;;  %v72_v60 = vmul.u32 2221713035, %v68_v49  ;;  %v69_v5 = vxor.u32 %v65_v58, %v61_v47  ;;  %v123_v18 = vxor.u32 %v119_v8, %v115_v61 }
  0x2b   :  { %v125_v56 = vmul.u32 2221713035, %v121_v52  ;;  %v126_v59 = vmul.u32 2221713035, %v122_v53  ;;  %v70_v23 = vxor.u32 %v66_v14, %v62_v4  ;;  %v71_v30 = vxor.u32 %v67_v21, %v63_v11 }
  0x2c   :  { %v128_v62 = vshrl.u32 %v124_v55, 16  ;;  %v76_v7 = vshrl.u32 %v72_v60, 16  ;;  %v73_v15 = vmul.u32 2221713035, %v69_v5  ;;  %v127_v27 = vmul.u32 2221713035, %v123_v18 }
  0x2d   :  { %v129_v63 = vshrl.u32 %v125_v56, 16  ;;  %v130_v0 = vshrl.u32 %v126_v59, 16  ;;  %v74_v32 = vmul.u32 2221713035, %v70_v23  ;;  %v75_v39 = vmul.u32 2221713035, %v71_v30 }
  0x2e   :  { %v132_v2 = vxor.u32 %v128_v62, %v124_v55  ;;  %v80_v17 = vxor.u32 %v76_v7, %v72_v60  ;;  %v77_v24 = vshrl.u32 %v73_v15, 16  ;;  %v131_v36 = vshrl.u32 %v127_v27, 16 }
  0x2f   :  { %v133_v3 = vxor.u32 %v129_v63, %v125_v56  ;;  %v134_v6 = vxor.u32 %v130_v0, %v126_v59  ;;  %v78_v41 = vshrl.u32 %v74_v32, 16  ;;  %v79_v49 = vshrl.u32 %v75_v39, 16 }
  0x30   :  { %v136_v9 = vshrl.u32 %v132_v2, 8  ;;  %v84_v26 = vshrl.u32 %v80_v17, 8  ;;  %v81_v33 = vxor.u32 %v77_v24, %v73_v15  ;;  %v135_v45 = vxor.u32 %v131_v36, %v127_v27 }
  0x31   :  { %v137_v10 = vshrl.u32 %v133_v3, 8  ;;  %v138_v16 = vshrl.u32 %v134_v6, 8  ;;  %v806_v50 = vxor.u32 %v78_v41, %v74_v32  ;;  %v813_v60 = vxor.u32 %v79_v49, %v75_v39 }
  0x32   :  { %v140_v12 = vadd.s32 1, %v136_v9  ;;  %v88_v35 = vadd.s32 1, %v84_v26  ;;  %v85_v42 = vshrl.u32 %v81_v33, 8  ;;  %v139_v55 = vshrl.u32 %v135_v45, 8 }
  0x33   :  { %v141_v13 = vadd.s32 1, %v137_v10  ;;  %v142_v25 = vadd.s32 1, %v138_v16  ;;  %v86_v61 = vshrl.u32 %v806_v50, 8  ;;  %v762_v5 = vmov 683565275  }
  0x34   :  { %v144_v19 = vcvt.s32.f32 %v140_v12  ;;  %v92_v44 = vcvt.s32.f32 %v88_v35  ;;  %v89_v51 = vadd.s32 1, %v85_v42  ;;  %v143_v0 = vadd.s32 1, %v139_v55 }
  0x35   :  { %v145_v20 = vcvt.s32.f32 %v141_v13  ;;  %v146_v34 = vcvt.s32.f32 %v142_v25  ;;  %v763_v8 = vmov 2475754826   ;;  %v764_v10 = vmov 2131351028  }
  0x36   :  { %v148_v22 = vmul.f32 5.9604645e-08, %v144_v19  ;;  %v96_v54 = vmul.f32 5.9604645e-08, %v92_v44  ;;  %v93_v62 = vcvt.s32.f32 %v89_v51  ;;  %v765_v12 = vmov 2102212464  }
  0x37   :  { %v149_v28 = vmul.f32 5.9604645e-08, %v145_v20  ;;  %v150_v43 = vmul.f32 5.9604645e-08, %v146_v34  ;;  %v766_v14 = vmov 920167782   ;;  %v767_v21 = vmov 1326507024  }
  0x38   :  { %v799_v29 = vmul.f32 6.2831855, %v148_v22  ;;  %681 = vlog2.f32 %v96_v54  ;;  %v147_v44 = vcvt.s32.f32 %v143_v0  ;;  %v87_v55 = vshrl.u32 %v813_v60, 8 }
  0x39   :  { %v802_v37 = vmul.f32 6.2831855, %v149_v28  ;;  %v808_v52 = vmul.f32 6.2831855, %v150_v43  ;;  %v97_v43 = vmul.f32 5.9604645e-08, %v93_v62 }
  0x3a   :  { %v199_v31 = vand.u32 2139095040, %v799_v29  ;;  %v196_v48 = vand.u32 2147483647, %v799_v29  ;;  %v151_v62 = vmul.f32 5.9604645e-08, %v147_v44 }
  0x3b   :  { %v302_v47 = vand.u32 2139095040, %v802_v37  ;;  %v299_v59 = vand.u32 2147483647, %v802_v37  ;;  %v405_v63 = vand.u32 2139095040, %v808_v52  ;;  %683 = vlog2.f32 %v97_v43 }
  0x3c   :  { %v200_v38 = vshrl.u32 %v199_v31, 23  ;;  %v203_v57 = vand.u32 8388607, %v196_v48 }
  0x3d   :  { %v303_v56 = vshrl.u32 %v302_v47, 23  ;;  %v306_v7 = vand.u32 8388607, %v299_v59  ;;  %v406_v19 = vshrl.u32 %v405_v63, 23 }
  0x3e   :  { %v641_v40 = vadd.s32 4294967169, %v200_v38  ;;  %v204_v3 = vor.u32 8388608, %v203_v57 }
  0x3f   :  { %v645_v2 = vadd.s32 4294967169, %v303_v56  ;;  %v307_v47 = vor.u32 8388608, %v306_v7  ;;  %v649_v54 = vadd.s32 4294967169, %v406_v19 }
  0x40   :  { %v206_v46 = vadd.s32 1, %v641_v40  ;;  %v244_v36 = vshll.u32 %v204_v3, 8 }
  0x41   :  { %v309_v23 = vadd.s32 1, %v645_v2 }
  0x42   :  { %vm207_vm0 = vcmp.gt.s32.totalorder %v206_v46, 0  ;;  %v682_v42 = vpop.eup %681 }
  0x43   :  { %v208_v53 = vsel %vm207_vm0, %v206_v46, 0  ;;  %vm310_vm5 = vcmp.gt.s32.totalorder %v309_v23, 0  ;;  %v153_v0 = vmul.f32 0.6931472, %v682_v42  ;;  %v865_v42 = vadd.s32 1, %v87_v55 }
  0x44   :  { %v210_v58 = vand.u32 31, %v208_v53  ;;  %v209_v1 = vshrl.u32 %v208_v53, 5  ;;  %v311_v49 = vsel %vm310_vm5, %v309_v23, 0 }
  0x45   :  { %v313_v63 = vand.u32 31, %v311_v49  ;;  %v312_v3 = vshrl.u32 %v311_v49, 5  ;;  %v402_v49 = vand.u32 2147483647, %v808_v52 }
  0x46   :  { %v211_v4 = vsub.s32 32, %v210_v58  ;;  %v213_v6 = vshll.u32 %v762_v5, %v210_v58  ;;  %v216_v9 = vshll.u32 %v763_v8, %v210_v58  ;;  %v219_v11 = vshll.u32 %v764_v10, %v210_v58 }
  0x47   :  { %v222_v13 = vshll.u32 %v765_v12, %v210_v58  ;;  %v225_v15 = vshll.u32 %v766_v14, %v210_v58  ;;  %vm228_vm1 = vcmp.lt.s32.totalorder %v209_v1, 1  ;;  %vm230_vm2 = vcmp.lt.s32.totalorder %v209_v1, 3 }
  0x48   :  { %v214_v16 = vshrl.u32 %v763_v8, %v211_v4  ;;  %v217_v17 = vshrl.u32 %v764_v10, %v211_v4  ;;  %v220_v18 = vshrl.u32 %v765_v12, %v211_v4  ;;  %v223_v20 = vshrl.u32 %v766_v14, %v211_v4 }
  0x49   :  { %v226_v22 = vshrl.u32 %v767_v21, %v211_v4  ;;  %v212_v24 = vshrl.u32 %v762_v5, %v211_v4  ;;  %vm231_vm3 = vcmp.lt.s32.totalorder %v209_v1, 4  ;;  %vm229_vm4 = vcmp.lt.s32.totalorder %v209_v1, 2 }
  0x4a   :  { %v215_v25 = vor.u32 %v214_v16, %v213_v6  ;;  %v218_v26 = vor.u32 %v217_v17, %v216_v9  ;;  %v221_v27 = vor.u32 %v220_v18, %v219_v11  ;;  %v224_v28 = vor.u32 %v223_v20, %v222_v13 }
  0x4b   :  { %v227_v30 = vor.u32 %v226_v22, %v225_v15  ;;  %v844_v58 = vadd.s32 1, %v86_v61  ;;  %v846_v1 = vshll.u32 %v307_v47, 8  ;;  %v314_v4 = vsub.s32 32, %v313_v63 }
  0x4c   :  { %v233_v31 = vsel %vm231_vm3, %v221_v27, 2102212464  ;;  %v236_v32 = vsel %vm228_vm1, %v215_v25, %v218_v26  ;;  %v240_v33 = vsel %vm228_vm1, %v218_v26, %v221_v27  ;;  %v237_v34 = vsel %vm231_vm3, %v224_v28, 920167782 }
  0x4d   :  { %v241_v35 = vsel %vm231_vm3, %v227_v30, 1326507024  ;;  %v232_v38 = vsel %vm228_vm1, %v212_v24, %v215_v25  ;;  %v234_v39 = vsel %vm230_vm2, %v218_v26, %v233_v31  ;;  %v238_v40 = vsel %vm230_vm2, %v221_v27, %v237_v34 }
  0x4e   :  { %v242_v41 = vsel %vm230_vm2, %v224_v28, %v241_v35  ;;  %v239_v45 = vsel %vm229_vm4, %v236_v32, %v238_v40  ;;  %v235_v50 = vsel %vm229_vm4, %v232_v38, %v234_v39  ;;  %v316_v60 = vshll.u32 %v762_v5, %v313_v63 }
  0x4f   :  { %v243_v46 = vsel %vm229_vm4, %v240_v33, %v242_v41  ;;  %v840_v56 = vmul.u32.u64.low %v244_v36, %v239_v45  ;;  %v841_v57 = vmul.u32.u64.high %v244_v36, %v239_v45, %v840_v56  ;;  %v251_v2 = vmul.u32 %v244_v36, %v235_v50 }
  0x50   :  { %v836_v51 = vmul.u32.u64.low %v244_v36, %v243_v46  ;;  %v837_v53 = vmul.u32.u64.high %v244_v36, %v243_v46, %v836_v51  ;;  %v412_v6 = vadd.s32 1, %v649_v54  ;;  %v319_v61 = vshll.u32 %v763_v8, %v313_v63  ;;  %v684_v36 = vpop.eup %683 }
  0x51   :  { %v254_v7 = vadd.s32 1, %v841_v57  ;;  %v322_v9 = vshll.u32 %v764_v10, %v313_v63  ;;  %v325_v11 = vshll.u32 %v765_v12, %v313_v63  ;;  %v315_v13 = vshrl.u32 %v762_v5, %v314_v4 }
  0x52   :  { %vm253_vm6 = vc.u32 %v837_v53, %v840_v56  ;;  %v317_v15 = vshrl.u32 %v763_v8, %v314_v4  ;;  %v320_v16 = vshrl.u32 %v764_v10, %v314_v4  ;;  %v323_v17 = vshrl.u32 %v765_v12, %v314_v4 }
  0x53   :  { %v255_v18 = vsel %vm253_vm6, %v254_v7, %v841_v57  ;;  %v326_v19 = vshrl.u32 %v766_v14, %v314_v4  ;;  %v328_v20 = vshll.u32 %v766_v14, %v313_v63  ;;  %v329_v22 = vshrl.u32 %v767_v21, %v314_v4 }
  0x54   :  { %v256_v23 = vadd.s32 %v255_v18, %v251_v2  ;;  %v318_v24 = vor.u32 %v317_v15, %v316_v60  ;;  %v321_v25 = vor.u32 %v320_v16, %v319_v61  ;;  %v324_v26 = vor.u32 %v323_v17, %v322_v9 }
  0x55   :  { %v327_v27 = vor.u32 %v326_v19, %v325_v11  ;;  %v330_v28 = vor.u32 %v329_v22, %v328_v20  ;;  %vm331_vm7 = vcmp.lt.s32.totalorder %v312_v3, 1  ;;  %vm332_vm8 = vcmp.lt.s32.totalorder %v312_v3, 2 }
  0x56   :  { %v257_v30 = vadd.s32 536870912, %v256_v23  ;;  %vm333_vm9 = vcmp.lt.s32.totalorder %v312_v3, 3  ;;  %vm334_vm10 = vcmp.lt.s32.totalorder %v312_v3, 4  ;;  %v335_v31 = vsel %vm331_vm7, %v315_v13, %v318_v24 }
  0x57   :  { %v336_v32 = vsel %vm334_vm10, %v324_v26, 2102212464  ;;  %v339_v33 = vsel %vm331_vm7, %v318_v24, %v321_v25  ;;  %v340_v34 = vsel %vm334_vm10, %v327_v27, 920167782  ;;  %v343_v35 = vsel %vm331_vm7, %v321_v25, %v324_v26 }
  0x58   :  { %v863_v38 = vshrl.u32 %v257_v30, 30  ;;  %v337_v39 = vsel %vm333_vm9, %v321_v25, %v336_v32  ;;  %v341_v40 = vsel %vm333_vm9, %v324_v26, %v340_v34  ;;  %v344_v41 = vsel %vm334_vm10, %v330_v28, 1326507024 }
  0x59   :  { %v342_v43 = vsel %vm332_vm8, %v339_v33, %v341_v40  ;;  %v345_v44 = vsel %vm333_vm9, %v327_v27, %v344_v41  ;;  %vm413_vm11 = vcmp.gt.s32.totalorder %v412_v6, 0  ;;  %v338_v46 = vsel %vm332_vm8, %v335_v31, %v337_v39 }
  0x5a   :  { %v259_v45 = vshll.u32 %v863_v38, 30  ;;  %v346_v47 = vsel %vm332_vm8, %v343_v35, %v345_v44  ;;  %v877_v54 = vmul.u32.u64.low %v846_v1, %v342_v43  ;;  %v878_v55 = vmul.u32.u64.high %v846_v1, %v342_v43, %v877_v54 }
  0x5b   :  { %v873_v50 = vmul.u32.u64.low %v846_v1, %v346_v47  ;;  %v874_v51 = vmul.u32.u64.high %v846_v1, %v346_v47, %v873_v50  ;;  %v881_v57 = vmul.f32 -0.2, %v153_v0  ;;  %v883_v63 = vmul.f32 6.2831855, %v151_v62 }
  0x5c   :  { %v885_v2 = vsub.s32 %v256_v23, %v259_v45  ;;  %v414_v4 = vsel %vm413_vm11, %v412_v6, 0  ;;  %v94_v60 = vcvt.s32.f32 %v844_v58  ;;  %v95_v7 = vcvt.s32.f32 %v865_v42 }
  0x5d   :  { %v416_v3 = vand.u32 31, %v414_v4  ;;  %v354_v9 = vmul.u32 %v846_v1, %v338_v46  ;;  %vm356_vm12 = vc.u32 %v874_v51, %v877_v54  ;;  %v357_v0 = vadd.s32 1, %v878_v55 }
  0x5e   :  { %v262_v61 = vsub.s32 0, %v885_v2  ;;  %v409_v62 = vand.u32 8388607, %v402_v49  ;;  %v896_v13 = vmul.f32 0.6931472, %v684_v36  ;;  %685 = vrsqrt.f32 %v881_v57 }
  0x5f   :  { %v417_v11 = vsub.s32 32, %v416_v3  ;;  %v508_v15 = vand.u32 2139095040, %v883_v63  ;;  %v252_v1 = vadd.s32 %v840_v56, %v837_v53  ;;  %v358_v16 = vsel %vm356_vm12, %v357_v0, %v878_v55 }
  0x60   :  { %v642_v6 = vmin.u32 %v262_v61, %v885_v2  ;;  %v419_v17 = vshll.u32 %v762_v5, %v416_v3  ;;  %v359_v20 = vadd.s32 %v358_v16, %v354_v9  ;;  %v422_v22 = vshll.u32 %v763_v8, %v416_v3 }
  0x61   :  { %v420_v18 = vshrl.u32 %v763_v8, %v417_v11  ;;  %v423_v23 = vshrl.u32 %v764_v10, %v417_v11  ;;  %v415_v24 = vshrl.u32 %v414_v4, 5  ;;  %v425_v25 = vshll.u32 %v764_v10, %v416_v3 }
  0x62   :  { %v264_v19 = vclz %v642_v6  ;;  %v426_v26 = vshrl.u32 %v765_v12, %v417_v11  ;;  %v428_v27 = vshll.u32 %v765_v12, %v416_v3  ;;  %v360_v56 = vadd.s32 536870912, %v359_v20 }
  0x63   :  { %v429_v28 = vshrl.u32 %v766_v14, %v417_v11  ;;  %v509_v30 = vshrl.u32 %v508_v15, 23  ;;  %v418_v31 = vshrl.u32 %v762_v5, %v417_v11  ;;  %v421_v32 = vor.u32 %v420_v18, %v419_v17 }
  0x64   :  { %v643_v53 = vadd.s32 4294967294, %v264_v19  ;;  %v431_v33 = vshll.u32 %v766_v14, %v416_v3  ;;  %v432_v34 = vshrl.u32 %v767_v21, %v417_v11  ;;  %v915_v35 = vshrl.u32 %v360_v56, 30 }
  0x65   :  { %v424_v36 = vor.u32 %v423_v23, %v422_v22  ;;  %v427_v39 = vor.u32 %v426_v26, %v425_v25  ;;  %v430_v41 = vor.u32 %v429_v28, %v428_v27  ;;  %vm434_vm14 = vcmp.lt.s32.totalorder %v415_v24, 1 }
  0x66   :  { %vm644_vm13 = vcmp.lt.s32.totalorder %v643_v53, 0  ;;  %vm437_vm15 = vcmp.lt.s32.totalorder %v415_v24, 4  ;;  %v362_v46 = vshll.u32 %v915_v35, 30  ;;  %v410_v47 = vor.u32 8388608, %v409_v62 }
  0x67   :  { %v267_v40 = vsel %vm644_vm13, 0, %v643_v53  ;;  %v433_v50 = vor.u32 %v432_v34, %v431_v33  ;;  %v439_v55 = vsel %vm437_vm15, %v427_v39, 2102212464  ;;  %v653_v4 = vadd.s32 4294967169, %v509_v30 }
  0x68   :  { %v268_v43 = vsub.s32 32, %v267_v40  ;;  %v269_v44 = vshll.u32 %v885_v2, %v267_v40  ;;  %v272_v45 = vsub.s32 4294967266, %v267_v40  ;;  %v686_v3 = vpop.eup %685  ;;  %v920_v0 = vsub.s32 %v359_v20, %v362_v46 }
  0x69   :  { %vm436_vm0 = vcmp.lt.s32.totalorder %v415_v24, 3  ;;  %vm198_vm1 = vcmp.lt.s32.totalorder %v799_v29, 0  ;;  %vm435_vm2 = vcmp.lt.s32.totalorder %v415_v24, 2  ;;  %v438_v11 = vsel %vm434_vm14, %v418_v31, %v421_v32 }
  0x6a   :  { %v270_v61 = vshrl.u32 %v252_v1, %v268_v43  ;;  %v273_v9 = vadd.s32 127, %v272_v45  ;;  %v442_v2 = vsel %vm434_vm14, %v421_v32, %v424_v36  ;;  %v443_v6 = vsel %vm437_vm15, %v430_v41, 920167782 }
  0x6b   :  { %vm928_vm3 = vcmp.le.f32.partialorder %v196_v48, 0.7853982  ;;  %v365_v16 = vsub.s32 0, %v920_v0  ;;  %v440_v17 = vsel %vm436_vm0, %v424_v36, %v439_v55  ;;  %v444_v18 = vsel %vm436_vm0, %v427_v39, %v443_v6 }
  0x6c   :  { %v271_v15 = vor.u32 %v270_v61, %v269_v44  ;;  %v274_v1 = vshll.u32 %v273_v9, 23  ;;  %v446_v19 = vsel %vm434_vm14, %v424_v36, %v427_v39  ;;  %v447_v20 = vsel %vm437_vm15, %v433_v50, 1326507024 }
  0x6d   :  { %v450_v22 = vshll.u32 %v410_v47, 8  ;;  %v646_v48 = vmin.u32 %v365_v16, %v920_v0  ;;  %v445_v26 = vsel %vm435_vm2, %v442_v2, %v444_v18  ;;  %v940_v27 = vmul.f32 -0.2, %v896_v13 }
  0x6e   :  { %v275_v23 = vor.u32 4788187, %v274_v1  ;;  %v278_v25 = vcvt.s32.f32 %v271_v15  ;;  %v282_v53 = vsub.s32 4, %v863_v38  ;;  %v441_v56 = vsel %vm435_vm2, %v438_v11, %v440_v17 }
  0x6f   :  { %v448_v28 = vsel %vm436_vm0, %v430_v41, %v447_v20  ;;  %v367_v31 = vclz %v646_v48  ;;  %v515_v33 = vadd.s32 1, %v653_v4  ;;  %v505_v44 = vand.u32 2147483647, %v883_v63 }
  0x70   :  { %v276_v30 = vand.u32 2147483647, %v275_v23  ;;  %v449_v32 = vsel %vm435_vm2, %v446_v19, %v448_v28  ;;  %v949_v39 = vmul.u32.u64.low %v450_v22, %v445_v26  ;;  %v950_v40 = vmul.u32.u64.high %v450_v22, %v445_v26, %v949_v39 }
  0x71   :  { %v946_v34 = vmul.u32.u64.low %v450_v22, %v449_v32  ;;  %v947_v36 = vmul.u32.u64.high %v450_v22, %v449_v32, %v946_v34  ;;  %v647_v43 = vadd.s32 4294967294, %v367_v31  ;;  %vm516_vm4 = vcmp.gt.s32.totalorder %v515_v33, 0 }
  0x72   :  { %v279_v13 = vmul.f32 %v278_v25, %v276_v30  ;;  %v955_v45 = vmul.f32 %v686_v3, %v881_v57  ;;  %687 = vrsqrt.f32 %v940_v27  ;;  %v355_v24 = vadd.s32 %v877_v54, %v874_v51 }
  0x73   :  { %v517_v41 = vsel %vm516_vm4, %v515_v33, 0  ;;  %vm648_vm5 = vcmp.lt.s32.totalorder %v647_v43, 0  ;;  %v457_v47 = vmul.u32 %v450_v22, %v441_v56  ;;  %v283_v55 = vsel %vm198_vm1, %v282_v53, %v863_v38 }
  0x74   :  { %v280_v46 = vxor.u32 2147483648, %v279_v13  ;;  %v519_v50 = vand.u32 31, %v517_v41  ;;  %v370_v4 = vsel %vm648_vm5, 0, %v647_v43  ;;  %vm459_vm6 = vc.u32 %v947_v36, %v949_v39 }
  0x75   :  { %v460_v3 = vadd.s32 1, %v950_v40  ;;  %v371_v9 = vsub.s32 32, %v370_v4  ;;  %v372_v51 = vshll.u32 %v920_v0, %v370_v4  ;;  %v375_v54 = vsub.s32 4294967266, %v370_v4 }
  0x76   :  { %v281_v61 = vsel %vm198_vm1, %v280_v46, %v279_v13  ;;  %v512_v38 = vand.u32 8388607, %v505_v44  ;;  %v520_v6 = vsub.s32 32, %v519_v50  ;;  %vm301_vm7 = vcmp.lt.s32.totalorder %v802_v37, 0 }
  0x77   :  { %v284_v11 = vsel %vm928_vm3, %v799_v29, %v281_v61  ;;  %v461_v2 = vsel %vm459_vm6, %v460_v3, %v950_v40  ;;  %v373_v15 = vshrl.u32 %v355_v24, %v371_v9  ;;  %v376_v1 = vadd.s32 127, %v375_v54 }
  0x78   :  { %689 = vcosq.f32 %v284_v11  ;;  %v462_v16 = vadd.s32 %v461_v2, %v457_v47  ;;  %v285_v0 = vsel %vm928_vm3, 0, %v283_v55  ;;  %v978_v17 = vshrl.u32 %v517_v41, 5 }
  0x79   :  { %691 = vsinq.f32 %v284_v11  ;;  %v522_v18 = vshll.u32 %v762_v5, %v519_v50  ;;  %vm983_vm8 = vcmp.le.f32.partialorder %v299_v59, 0.7853982  ;;  %v374_v20 = vor.u32 %v373_v15, %v372_v51 }
  0x7a   :  { %v377_v22 = vshll.u32 %v376_v1, 23  ;;  %v463_v23 = vadd.s32 536870912, %v462_v16  ;;  %v523_v25 = vshrl.u32 %v763_v8, %v520_v6  ;;  %v525_v48 = vshll.u32 %v763_v8, %v519_v50 }
  0x7b   :  { %v526_v62 = vshrl.u32 %v764_v10, %v520_v6  ;;  %v528_v26 = vshll.u32 %v764_v10, %v519_v50  ;;  %v531_v53 = vshll.u32 %v765_v12, %v519_v50  ;;  %v381_v28 = vcvt.s32.f32 %v374_v20 }
  0x7c   :  { %v378_v56 = vor.u32 4788187, %v377_v22  ;;  %v992_v30 = vshrl.u32 %v463_v23, 30  ;;  %v529_v59 = vshrl.u32 %v765_v12, %v520_v6  ;;  %v688_v31 = vpop.eup %687  ;;  %v995_v32 = vand.u32 3, %v285_v0 }
  0x7d   :  { %v385_v33 = vsub.s32 4, %v915_v35  ;;  %v513_v34 = vor.u32 8388608, %v512_v38  ;;  %v532_v8 = vshrl.u32 %v766_v14, %v520_v6  ;;  %v521_v10 = vshrl.u32 %v762_v5, %v520_v6 }
  0x7e   :  { %v379_v40 = vand.u32 2147483647, %v378_v56  ;;  %v465_v13 = vshll.u32 %v992_v30, 30  ;;  %v524_v43 = vor.u32 %v523_v25, %v522_v18  ;;  %v527_v24 = vor.u32 %v526_v62, %v525_v48 }
  0x7f   :  { %v533_v41 = vor.u32 %v532_v8, %v531_v53  ;;  %v534_v46 = vshll.u32 %v766_v14, %v519_v50  ;;  %v535_v12 = vshrl.u32 %v767_v21, %v520_v6  ;;  %vm166_vm9 = vcmp.eq.f32.partialorder %v881_v57, inf }
  0x80   :  { %v382_v47 = vmul.f32 %v381_v28, %v379_v40  ;;  %v1004_v55 = vsub.s32 %v462_v16, %v465_v13  ;;  %v530_v4 = vor.u32 %v529_v59, %v528_v26  ;;  %vm540_vm10 = vcmp.lt.s32.totalorder %v978_v17, 4 }
  0x81   :  { %vm291_vm11 = vcmp.eq.s32.totalorder %v995_v32, 0  ;;  %vm294_vm12 = vcmp.eq.s32.totalorder %v995_v32, 2  ;;  %v386_v5 = vsel %vm301_vm7, %v385_v33, %v915_v35  ;;  %vm537_vm13 = vcmp.lt.s32.totalorder %v978_v17, 1 }
  0x82   :  { %v690_v14 = vpop.eup %689  ;;  %vm290_vm14 = vcmp.lt.s32.totalorder %v995_v32, 2  ;;  %v383_v21 = vxor.u32 2147483648, %v382_v47  ;;  %v468_v50 = vsub.s32 0, %v1004_v55  ;;  %v542_v3 = vsel %vm540_vm10, %v530_v4, 2102212464 }
  0x83   :  { %v553_v61 = vshll.u32 %v513_v34, 8  ;;  %v692_v9 = vpop.eup %691  ;;  %v536_v51 = vor.u32 %v535_v12, %v534_v46  ;;  %vm538_vm15 = vcmp.lt.s32.totalorder %v978_v17, 2  ;;  %vm539_vm0 = vcmp.lt.s32.totalorder %v978_v17, 3 }
  0x84   :  { %v546_v35 = vsel %vm540_vm10, %v533_v41, 920167782  ;;  %vm168_vm1 = vcmp.eq.f32.partialorder %v881_v57, 0.0  ;;  %v384_v54 = vsel %vm301_vm7, %v383_v21, %v382_v47  ;;  %v650_v11 = vmin.u32 %v468_v50, %v1004_v55 }
  0x85   :  { %v541_v2 = vsel %vm537_vm13, %v521_v10, %v524_v43  ;;  %v545_v38 = vsel %vm537_vm13, %v524_v43, %v527_v24  ;;  %v295_v6 = vxor.u32 2147483648, %v690_v14  ;;  %v387_v15 = vsel %vm983_vm8, %v802_v37, %v384_v54 }
  0x86   :  { %v543_v1 = vsel %vm539_vm0, %v527_v24, %v542_v3  ;;  %v549_v16 = vsel %vm537_vm13, %v527_v24, %v530_v4  ;;  %v292_v0 = vxor.u32 2147483648, %v692_v9  ;;  %693 = vcosq.f32 %v387_v15 }
  0x87   :  { %v470_v18 = vclz %v650_v11  ;;  %v547_v20 = vsel %vm539_vm0, %v530_v4, %v546_v35  ;;  %v388_v22 = vsel %vm983_vm8, 0, %v386_v5  ;;  %695 = vsinq.f32 %v387_v15 }
  0x88   :  { %v548_v23 = vsel %vm538_vm15, %v545_v38, %v547_v20  ;;  %v550_v25 = vsel %vm540_vm10, %v536_v51, 1326507024  ;;  %v458_v48 = vadd.s32 %v949_v39, %v947_v36  ;;  %v544_v26 = vsel %vm538_vm15, %v541_v2, %v543_v1  ;;  %v608_v20 = vld [vmem:[#allocation4] sm:$0xff] }
  0x89   :  { %v651_v62 = vadd.s32 4294967294, %v470_v18  ;;  %v551_v53 = vsel %vm539_vm0, %v533_v41, %v550_v25  ;;  %v296_v19 = vsel %vm294_vm12, %v295_v6, %v692_v9  ;;  %v293_v36 = vsel %vm291_vm11, %v690_v14, %v292_v0 }
  0x8a   :  { %v552_v56 = vsel %vm538_vm15, %v549_v16, %v551_v53  ;;  %v1054_v28 = vmul.u32.u64.low %v553_v61, %v548_v23  ;;  %v1055_v59 = vmul.u32.u64.high %v553_v61, %v548_v23, %v1054_v28  ;;  %v167_v34 = vsel %vm166_vm9, %v881_v57, %v955_v45 }
  0x8b   :  { %vm652_vm2 = vcmp.lt.s32.totalorder %v651_v62, 0  ;;  %v1060_v39 = vmul.u32.u64.low %v553_v61, %v552_v56  ;;  %v1061_v33 = vmul.u32.u64.high %v553_v61, %v552_v56, %v1060_v39  ;;  %v169_v8 = vand.u32 2147483648, %v881_v57 }
  0x8c   :  { %v172_v17 = vmul.f32 %v688_v31, %v940_v27  ;;  %v473_v40 = vsel %vm652_vm2, 0, %v651_v62  ;;  %v392_v13 = vand.u32 3, %v388_v22  ;;  %v560_v24 = vmul.u32 %v553_v61, %v544_v26 }
  0x8d   :  { %v474_v10 = vsub.s32 32, %v473_v40  ;;  %v478_v43 = vsub.s32 4294967266, %v473_v40  ;;  %vm173_vm3 = vcmp.eq.f32.partialorder %v940_v27, inf  ;;  %vm288_vm4 = vweird.f32 %v799_v29 }
  0x8e   :  { %v297_v41 = vsel %vm290_vm14, %v293_v36, %v296_v19  ;;  %v563_v46 = vadd.s32 1, %v1055_v59  ;;  %v475_v45 = vshll.u32 %v1004_v55, %v473_v40  ;;  %vm562_vm5 = vc.u32 %v1061_v33, %v1054_v28 }
  0x8f   :  { %v476_v12 = vshrl.u32 %v458_v48, %v474_v10  ;;  %v479_v47 = vadd.s32 127, %v478_v43  ;;  %v170_v31 = vsel %vm168_vm1, %v169_v8, %v167_v34  ;;  %vm175_vm6 = vcmp.eq.f32.partialorder %v940_v27, 0.0 }
  0x90   :  { %v176_v4 = vand.u32 2147483648, %v940_v27  ;;  %v564_v5 = vsel %vm562_vm5, %v563_v46, %v1055_v59  ;;  %v694_v32 = vpop.eup %693  ;;  %v174_v14 = vsel %vm173_vm3, %v940_v27, %v172_v17  ;;  %vm397_vm7 = vcmp.eq.s32.totalorder %v392_v13, 2 }
  0x91   :  { %v480_v21 = vshll.u32 %v479_v47, 23  ;;  %v565_v55 = vadd.s32 %v564_v5, %v560_v24  ;;  %v696_v50 = vpop.eup %695  ;;  %v298_v3 = vsel %vm288_vm4, nan, %v297_v41  ;;  %vm393_vm8 = vcmp.lt.s32.totalorder %v392_v13, 2 }
  0x92   :  { %vm394_vm9 = vcmp.eq.s32.totalorder %v392_v13, 0  ;;  %v398_v57 = vxor.u32 2147483648, %v694_v32  ;;  %v395_v61 = vxor.u32 2147483648, %v696_v50  ;;  %v477_v9 = vor.u32 %v476_v12, %v475_v45 }
  0x93   :  { %v481_v51 = vor.u32 4788187, %v480_v21  ;;  %v566_v35 = vadd.s32 536870912, %v565_v55  ;;  %v98_v54 = vmul.f32 5.9604645e-08, %v94_v60  ;;  %vm391_vm10 = vweird.f32 %v802_v37 }
  0x94   :  { %v399_v11 = vsel %vm397_vm7, %v398_v57, %v696_v50  ;;  %v177_v2 = vsel %vm175_vm6, %v176_v4, %v174_v14  ;;  %v396_v38 = vsel %vm394_vm9, %v694_v32, %v395_v61  ;;  %v99_v29 = vmul.f32 5.9604645e-08, %v95_v7 }
  0x95   :  { %v1090_v6 = vshrl.u32 %v566_v35, 30  ;;  %v400_v15 = vsel %vm393_vm8, %v396_v38, %v399_v11  ;;  %v610_v1 = vmul.f32 %v298_v3, %v170_v31  ;;  %v482_v0 = vand.u32 2147483647, %v481_v51 }
  0x96   :  { %v401_v16 = vsel %vm391_vm10, nan, %v400_v15  ;;  %v484_v18 = vcvt.s32.f32 %v477_v9  ;;  %697 = vlog2.f32 %v98_v54  ;;  %vm404_vm11 = vcmp.lt.s32.totalorder %v808_v52, 0 }
  0x97   :  { %v568_v58 = vshll.u32 %v1090_v6, 30  ;;  %v611_v60 = vmul.f32 %v401_v16, %v177_v2  ;;  %699 = vlog2.f32 %v99_v29  ;;  %vm1098_vm12 = vcmp.le.f32.partialorder %v402_v49, 0.7853982 }
  0x98   :  { %v485_v22 = vmul.f32 %v484_v18, %v482_v0  ;;  %v561_v56 = vadd.s32 %v1054_v28, %v1061_v33  ;;  %v488_v28 = vsub.s32 4, %v992_v30  ;;  %vm507_vm14 = vcmp.lt.s32.totalorder %v883_v63, 0 }
  0x99   :  { %v569_v37 = vsub.s32 %v565_v55, %v568_v58  ;;  %v618_v27 = vcombine.low %v610_v1, %v611_v60  ;;  %vm1118_vm15 = vcmp.le.f32.partialorder %v505_v44, 0.7853982  ;;  %v591_v14 = vsub.s32 4, %v1090_v6 }
  0x9a   :  { %v486_v42 = vxor.u32 2147483648, %v485_v22  ;;  %v489_v47 = vsel %vm404_vm11, %v488_v28, %v992_v30  ;;  %vm494_vm6 = vweird.f32 %v808_v52 }
  0x9b   :  { %v571_v23 = vsub.s32 0, %v569_v37  ;;  %v622_v25 = vadd.f32 %v618_v27, %v608_v20  ;;  %v491_v4 = vsel %vm1098_vm12, 0, %v489_v47  ;;  %v592_v57 = vsel %vm507_vm14, %v591_v14, %v1090_v6 }
  0x9c   :  { %v487_v19 = vsel %vm404_vm11, %v486_v42, %v485_v22  ;;  %v495_v30 = vand.u32 3, %v491_v4  ;;  %v594_v51 = vsel %vm1118_vm15, 0, %v592_v57  ;;  %vm597_vm11 = vweird.f32 %v883_v63 }
  0x9d   :  { %v654_v48 = vmin.u32 %v571_v23, %v569_v37  ;;  %624 = vst [vmem:[#allocation7] sm:$0xff] %v622_v25  ;;  %v490_v49 = vsel %vm1098_vm12, %v808_v52, %v487_v19  ;;  %v598_v38 = vand.u32 3, %v594_v51 }
  0x9e   :  { %701 = vcosq.f32 %v490_v49  ;;  %vm497_vm0 = vcmp.eq.s32.totalorder %v495_v30, 0  ;;  %vm500_vm1 = vcmp.eq.s32.totalorder %v495_v30, 2  ;;  %vm496_vm3 = vcmp.lt.s32.totalorder %v495_v30, 2 }
  0x9f   :  { %v573_v7 = vclz %v654_v48  ;;  %703 = vsinq.f32 %v490_v49  ;;  %vm603_vm7 = vcmp.eq.s32.totalorder %v598_v38, 2  ;;  %vm600_vm9 = vcmp.eq.s32.totalorder %v598_v38, 0 }
  0xa0   :  { %v698_v26 = vpop.eup %697  ;;  %vm599_vm10 = vcmp.lt.s32.totalorder %v598_v38, 2 }
  0xa1   :  { %v655_v62 = vadd.s32 4294967294, %v573_v7  ;;  %v700_v59 = vpop.eup %699  ;;  %v157_v39 = vmul.f32 0.6931472, %v698_v26 }
  0xa2   :  { %v159_v40 = vmul.f32 0.6931472, %v700_v59 }
  0xa3   :  { %vm656_vm13 = vcmp.lt.s32.totalorder %v655_v62, 0  ;;  %v162_v43 = vmul.f32 -0.2, %v157_v39 }
  0xa4   :  { %v576_v36 = vsel %vm656_vm13, 0, %v655_v62  ;;  %v163_v33 = vmul.f32 -0.2, %v159_v40  ;;  %v609_v62 = vld [vmem:[#allocation4 + $0x8] sm:$0xff] }
  0xa5   :  { %v577_v34 = vsub.s32 32, %v576_v36  ;;  %v578_v8 = vshll.u32 %v569_v37, %v576_v36  ;;  %v581_v17 = vsub.s32 4294967266, %v576_v36  ;;  %705 = vrsqrt.f32 %v162_v43 }
  0xa6   :  { %707 = vrsqrt.f32 %v163_v33  ;;  %vm180_vm2 = vcmp.eq.f32.partialorder %v162_v43, inf  ;;  %v183_v15 = vand.u32 2147483648, %v162_v43  ;;  %vm187_vm4 = vcmp.eq.f32.partialorder %v163_v33, inf }
  0xa7   :  { %v579_v13 = vshrl.u32 %v561_v56, %v577_v34  ;;  %v582_v10 = vadd.s32 127, %v581_v17  ;;  %vm182_vm5 = vcmp.eq.f32.partialorder %v162_v43, 0.0  ;;  %v190_v0 = vand.u32 2147483648, %v163_v33 }
  0xa8   :  { %v702_v21 = vpop.eup %701  ;;  %vm189_vm8 = vcmp.eq.f32.partialorder %v163_v33, 0.0 }
  0xa9   :  { %v580_v24 = vor.u32 %v579_v13, %v578_v8  ;;  %v583_v41 = vshll.u32 %v582_v10, 23  ;;  %v704_v50 = vpop.eup %703  ;;  %v501_v9 = vxor.u32 2147483648, %v702_v21 }
  0xaa   :  { %v498_v44 = vxor.u32 2147483648, %v704_v50 }
  0xab   :  { %v584_v46 = vor.u32 4788187, %v583_v41  ;;  %v587_v45 = vcvt.s32.f32 %v580_v24  ;;  %v502_v2 = vsel %vm500_vm1, %v501_v9, %v704_v50 }
  0xac   :  { %v499_v11 = vsel %vm497_vm0, %v702_v21, %v498_v44 }
  0xad   :  { %v585_v12 = vand.u32 2147483647, %v584_v46  ;;  %v503_v1 = vsel %vm496_vm3, %v499_v11, %v502_v2 }
  0xae   :  { %v504_v20 = vsel %vm494_vm6, nan, %v503_v1 }
  0xaf   :  { %v588_v31 = vmul.f32 %v587_v45, %v585_v12  ;;  %v706_v61 = vpop.eup %705 }
  0xb0   :  { %v708_v35 = vpop.eup %707  ;;  %v179_v54 = vmul.f32 %v706_v61, %v162_v43 }
  0xb1   :  { %v589_v32 = vxor.u32 2147483648, %v588_v31  ;;  %v186_v29 = vmul.f32 %v708_v35, %v163_v33 }
  0xb2   :  { %v181_v6 = vsel %vm180_vm2, %v162_v43, %v179_v54 }
  0xb3   :  { %v590_v55 = vsel %vm507_vm14, %v589_v32, %v588_v31  ;;  %v188_v58 = vsel %vm187_vm4, %v163_v33, %v186_v29  ;;  %v184_v37 = vsel %vm182_vm5, %v183_v15, %v181_v6 }
  0xb4   :  { %v593_v3 = vsel %vm1118_vm15, %v883_v63, %v590_v55  ;;  %v191_v23 = vsel %vm189_vm8, %v190_v0, %v188_v58  ;;  %v612_v52 = vmul.f32 %v504_v20, %v184_v37 }
  0xb5   :  { %709 = vcosq.f32 %v593_v3 }
  0xb6   :  { %711 = vsinq.f32 %v593_v3 }
  0xbf   :  { %v710_v16 = vpop.eup %709 }
  0xc0   :  { %v712_v18 = vpop.eup %711  ;;  %v604_v60 = vxor.u32 2147483648, %v710_v16 }
  0xc1   :  { %v601_v27 = vxor.u32 2147483648, %v712_v18 }
  0xc2   :  { %v605_v22 = vsel %vm603_vm7, %v604_v60, %v712_v18 }
  0xc3   :  { %v602_v25 = vsel %vm600_vm9, %v710_v16, %v601_v27 }
  0xc4   :  { %v606_v48 = vsel %vm599_vm10, %v602_v25, %v605_v22 }
  0xc5   :  { %v607_v42 = vsel %vm597_vm11, nan, %v606_v48 }
  0xc6   :  { %v613_v7 = vmul.f32 %v607_v42, %v191_v23 }
  0xc8   :  { %v619_v26 = vcombine.low %v612_v52, %v613_v7 }
  0xca   :  { %v623_v53 = vadd.f32 %v619_v26, %v609_v62 }
  0xcc   :  { %625 = vst [vmem:[#allocation7 + $0x8] sm:$0xff] %v623_v53 }
  0xcd   :  { %746 = shalt.err (!%p743_p12)
}
  0xce   :  { %s747_s26 = scalar_lea.hbm %s1145_s2, 256 }
  0xcf   :  { %p748_p13 = scmp.ne.s32.totalorder %s1145_s2, %s747_s26  ;;  %p751_p0 = scmp.lt.u32.totalorder %s747_s26, %s1145_s2 }
  0xd1   :  { %p753_p1 = pnand %p751_p0, %p748_p13 }
  0xd3   :  { %756 = shalt.err (!%p753_p1)
}
  0xd4   :  { %635 = dma.vmem_to_hbm [thread:$0]  %s633_s1, 256, %s1145_s2, [#allocation6]  }
  0xd5   :  { %759 = dma.done.wait [#allocation6], 256  }
  0xd6   :  { %760 = vsyncadd [#allocation6], 4294967040 }
  0xd7   :  { %639 = vsyncpa [#allocation5], 1 }
  0xd8   :  { %640 = vsyncpa [#allocation6], 1 }

</bundles_post_ra>
